<compile_context>
chip_gen: v5e
topology: v5e:2x2
jax: 0.10.0
libtpu: 0.0.40
codegen_flags: <defaults>
</compile_context>

<pallas_src>
import functools

import jax
import jax.numpy as jnp
from jax.experimental import pallas as pl
from jax.experimental.pallas import tpu as pltpu

BN_EPS = 1e-5
N_STEPS = 10  # fixed RK4 steps over t in [0, 1]


def liquid_nn_kernel(
    x_ref,
    w_in_ref, b_in_ref,              # fc_in with folded BatchNorm (w bf16, b f32)
    w1_ref, b1_ref, w2_ref, b2_ref,  # ODEF (w bf16, b f32)
    w_out_ref, b_out_ref,            # fc_out (lane-padded; w bf16, b f32)
    o_ref,
    *,
    n_steps,
):
    f32 = jnp.float32
    bf16 = jnp.bfloat16

    x = x_ref[...]
    tile_b = x.shape[0]
    half = tile_b // 2  # wrapper guarantees tile_b % 16 == 0 -> half is sublane-aligned

    # Resident weights (bf16) / biases (f32), loaded once per grid step.
    w_in = w_in_ref[...]
    w1 = w1_ref[...]
    w2 = w2_ref[...]
    w_out = w_out_ref[...]
    b_in = b_in_ref[...]    # (1, H)   broadcast-add, never materialized to (tile_b, H)
    b1 = b1_ref[...]        # (1, 2H)
    b2 = b2_ref[...]        # (1, H)
    b_out = b_out_ref[...]  # (1, out_pad)

    # fc_in (BatchNorm already folded into w_in/b_in), then ReLU.
    h = jnp.dot(x.astype(bf16), w_in, preferred_element_type=f32) + b_in
    h = jnp.maximum(h, 0.0)

    # Dropout(p=0.4) in eval mode -> identity.

    # Two independent batch sub-tiles interleaved through the RK4 chain so the
    # scheduler can hide one chain's MXU drain / VPU work under the other's.
    h_a = h[:half]
    h_b = h[half:]

    dt = 1.0 / n_steps

    def odef_pair(ha, hb):
        za = jnp.dot(ha.astype(bf16), w1, preferred_element_type=f32)
        zb = jnp.dot(hb.astype(bf16), w1, preferred_element_type=f32)
        za = jnp.maximum(za + b1, 0.0)
        zb = jnp.maximum(zb + b1, 0.0)
        fa = jnp.dot(za.astype(bf16), w2, preferred_element_type=f32) + b2
        fb = jnp.dot(zb.astype(bf16), w2, preferred_element_type=f32) + b2
        return fa, fb

    def rk4_step(_, carry):
        ha, hb = carry
        # Running accumulator: only one k_i live at a time.
        k_a, k_b = odef_pair(ha, hb)                                   # k1
        acc_a = ha + (dt / 6.0) * k_a
        acc_b = hb + (dt / 6.0) * k_b
        k_a, k_b = odef_pair(ha + (0.5 * dt) * k_a, hb + (0.5 * dt) * k_b)  # k2
        acc_a = acc_a + (dt / 3.0) * k_a
        acc_b = acc_b + (dt / 3.0) * k_b
        k_a, k_b = odef_pair(ha + (0.5 * dt) * k_a, hb + (0.5 * dt) * k_b)  # k3
        acc_a = acc_a + (dt / 3.0) * k_a
        acc_b = acc_b + (dt / 3.0) * k_b
        k_a, k_b = odef_pair(ha + dt * k_a, hb + dt * k_b)                  # k4
        return acc_a + (dt / 6.0) * k_a, acc_b + (dt / 6.0) * k_b

    h_a, h_b = jax.lax.fori_loop(0, n_steps, rk4_step, (h_a, h_b))

    # fc_out into a lane-dense (>=128-wide) slab; wrapper slices real columns.
    y_a = jnp.dot(h_a.astype(bf16), w_out, preferred_element_type=f32) + b_out
    y_b = jnp.dot(h_b.astype(bf16), w_out, preferred_element_type=f32) + b_out
    o_ref[...] = jnp.concatenate([y_a, y_b], axis=0).astype(o_ref.dtype)


def liquid_nn_forward(x, params, *, tile_b=512, n_steps=N_STEPS):
    """x: (B, input_dim) f32. params: dict from init_params. Returns (B, output_dim) f32."""
    B, input_dim = x.shape
    hidden_dim = params["w_in"].shape[1]
    out_dim = params["w_out"].shape[1]

    # ---- one-time param prep (outside the kernel) ----
    # Fold eval-mode BatchNorm into fc_in:  w' = w * s,  b' = (b - mean) * s + beta.
    scale = params["gamma"] * jax.lax.rsqrt(params["rvar"] + BN_EPS)
    w_in = (params["w_in"] * scale).astype(jnp.bfloat16)
    b_in = (params["b_in"] - params["rmean"]) * scale + params["beta"]

    w1 = params["w1"].astype(jnp.bfloat16)
    b1 = params["b1"]
    w2 = params["w2"].astype(jnp.bfloat16)
    b2 = params["b2"]

    # Lane-dense output slab: pad output features up to a multiple of 128.
    out_pad = -(-out_dim // 128) * 128
    w_out = (
        jnp.zeros((hidden_dim, out_pad), jnp.float32)
        .at[:, :out_dim].set(params["w_out"])
        .astype(jnp.bfloat16)
    )
    b_out = jnp.zeros((1, out_pad), jnp.float32).at[:, :out_dim].set(params["b_out"])

    # ---- batch tiling ----
    def round_up(v, m):
        return -(-v // m) * m

    # Balance tiles (no tail-padding cliff), keep >= 2 tiles for moderate B so
    # both v7x TensorCores get work (no-op on v5e/v6e), and keep tile_b a
    # multiple of 16 so the kernel can split each tile into two sublane-aligned
    # RK4 chains.
    n_tiles = max(pl.cdiv(B, tile_b), 2 if B >= 32 else 1)
    tile_b = round_up(pl.cdiv(B, n_tiles), 16)
    b_pad = round_up(B, tile_b)
    x_p = x if b_pad == B else jnp.pad(x, ((0, b_pad - B), (0, 0)))
    grid = (b_pad // tile_b,)

    # ---- VMEM budget (resident weights + pipelined tiles + RK4 working set) ----
    weight_bytes = 2 * (w_in.size + w1.size + w2.size + w_out.size)   # bf16
    bias_bytes = 4 * (b_in.size + b1.size + b2.size + b_out.size)     # f32
    tile_bytes = 4 * tile_b * (input_dim + out_pad) * 2               # double-buffered x/out
    work_bytes = 4 * tile_b * hidden_dim * 12                         # rough RK4 working set
    vmem_limit = int(
        min(max(32 << 20, 2 * (weight_bytes + bias_bytes + tile_bytes + work_bytes)),
            64 << 20)  # <= physical VMEM on v5e/v6e/v7x
    )

    def resident(arr):
        # Full-array block with constant index_map -> stays in VMEM across grid steps.
        return pl.BlockSpec(arr.shape, lambda i: (0, 0))

    in_specs = [
        pl.BlockSpec((tile_b, input_dim), lambda i: (i, 0)),  # x tile (pipelined)
        resident(w_in), resident(b_in),
        resident(w1), resident(b1),
        resident(w2), resident(b2),
        resident(w_out), resident(b_out),
    ]
    out_specs = pl.BlockSpec((tile_b, out_pad), lambda i: (i, 0))

    flops = 2 * b_pad * (
        input_dim * hidden_dim
        + n_steps * 4 * (hidden_dim * (2 * hidden_dim) + (2 * hidden_dim) * hidden_dim)
        + hidden_dim * out_pad
    )
    bytes_accessed = (
        4 * (b_pad * input_dim + b_pad * out_pad) + weight_bytes + bias_bytes
    )

    out = pl.pallas_call(
        functools.partial(liquid_nn_kernel, n_steps=n_steps),
        out_shape=jax.ShapeDtypeStruct((b_pad, out_pad), jnp.float32),
        grid=grid,
        in_specs=in_specs,
        out_specs=out_specs,
        compiler_params=pltpu.CompilerParams(
            dimension_semantics=("parallel",),
            vmem_limit_bytes=vmem_limit,
        ),
        cost_estimate=pl.CostEstimate(
            flops=flops, transcendentals=0, bytes_accessed=bytes_accessed
        ),
    )(
        x_p,
        w_in, b_in,
        w1, b1, w2, b2,
        w_out, b_out,
    )
    return out[:B, :out_dim]


def init_params(key, input_dim, hidden_dim, output_dim):
    """Deterministic init mimicking nn.Linear (uniform +/- 1/sqrt(fan_in)) and
    default BatchNorm1d stats (gamma=1, beta=0, running_mean=0, running_var=1)."""
    def linear(key, fan_in, fan_out):
        kw, kb = jax.random.split(key)
        bound = 1.0 / jnp.sqrt(fan_in)
        w = jax.random.uniform(kw, (fan_in, fan_out), jnp.float32, -bound, bound)
        b = jax.random.uniform(kb, (1, fan_out), jnp.float32, -bound, bound)
        return w, b

    k_in, k1, k2, k_out = jax.random.split(key, 4)
    w_in, b_in = linear(k_in, input_dim, hidden_dim)
    w1, b1 = linear(k1, hidden_dim, hidden_dim * 2)
    w2, b2 = linear(k2, hidden_dim * 2, hidden_dim)
    w_out, b_out = linear(k_out, hidden_dim, output_dim)

    return {
        "w_in": w_in, "b_in": b_in,
        "gamma": jnp.ones((1, hidden_dim), jnp.float32),
        "beta": jnp.zeros((1, hidden_dim), jnp.float32),
        "rmean": jnp.zeros((1, hidden_dim), jnp.float32),
        "rvar": jnp.ones((1, hidden_dim), jnp.float32),
        "w1": w1, "b1": b1,
        "w2": w2, "b2": b2,
        "w_out": w_out, "b_out": b_out,
    }


if __name__ == "__main__":
    key = jax.random.PRNGKey(0)
    k_param, k_x = jax.random.split(key)

    B, input_dim, hidden_dim, output_dim = 8, 16, 32, 8
    params = init_params(k_param, input_dim, hidden_dim, output_dim)
    x = jax.random.normal(k_x, (B, input_dim), jnp.float32)

    out = liquid_nn_forward(x, params)
    jax.block_until_ready(out)
    assert out.shape == (B, output_dim)
    print("KERNEL_OK")
</pallas_src>

<mosaic_0001>
module attributes {stable_mosaic.version = 11 : i64} {
  func.func @liquid_nn_kernel(%arg0: i32, %arg1: memref<16x16xf32, #tpu.memory_space<vmem>>, %arg2: memref<16x32xbf16, #tpu.memory_space<vmem>>, %arg3: memref<1x32xf32, #tpu.memory_space<vmem>>, %arg4: memref<32x64xbf16, #tpu.memory_space<vmem>>, %arg5: memref<1x64xf32, #tpu.memory_space<vmem>>, %arg6: memref<64x32xbf16, #tpu.memory_space<vmem>>, %arg7: memref<1x32xf32, #tpu.memory_space<vmem>>, %arg8: memref<32x128xbf16, #tpu.memory_space<vmem>>, %arg9: memref<1x128xf32, #tpu.memory_space<vmem>>, %arg10: memref<16x128xf32, #tpu.memory_space<vmem>>) attributes {dimension_semantics = [#tpu.dimension_semantics<parallel>], iteration_bounds = array<i64: 1>, scalar_prefetch = 0 : i64, scratch_operands = 0 : i64, tpu.core_type = #tpu.core_type<tc>, window_params = [{transform_indices = @transform_0, window_bounds = array<i64: 16, 16>}, {pipeline_mode = #tpu.pipeline_mode<synchronous>, transform_indices = @transform_1, window_bounds = array<i64: 16, 32>}, {pipeline_mode = #tpu.pipeline_mode<synchronous>, transform_indices = @transform_2, window_bounds = array<i64: 1, 32>}, {pipeline_mode = #tpu.pipeline_mode<synchronous>, transform_indices = @transform_3, window_bounds = array<i64: 32, 64>}, {pipeline_mode = #tpu.pipeline_mode<synchronous>, transform_indices = @transform_4, window_bounds = array<i64: 1, 64>}, {pipeline_mode = #tpu.pipeline_mode<synchronous>, transform_indices = @transform_5, window_bounds = array<i64: 64, 32>}, {pipeline_mode = #tpu.pipeline_mode<synchronous>, transform_indices = @transform_6, window_bounds = array<i64: 1, 32>}, {pipeline_mode = #tpu.pipeline_mode<synchronous>, transform_indices = @transform_7, window_bounds = array<i64: 32, 128>}, {pipeline_mode = #tpu.pipeline_mode<synchronous>, transform_indices = @transform_8, window_bounds = array<i64: 1, 128>}, {transform_indices = @transform_9, window_bounds = array<i64: 16, 128>}]} {
    %c0 = arith.constant 0 : index
    %c0_0 = arith.constant 0 : index
    %0 = vector.load %arg1[%c0, %c0_0] : memref<16x16xf32, #tpu.memory_space<vmem>>, vector<16x16xf32>
    %c0_1 = arith.constant 0 : index
    %c0_2 = arith.constant 0 : index
    %1 = vector.load %arg2[%c0_1, %c0_2] : memref<16x32xbf16, #tpu.memory_space<vmem>>, vector<16x32xbf16>
    %c0_3 = arith.constant 0 : index
    %c0_4 = arith.constant 0 : index
    %2 = vector.load %arg4[%c0_3, %c0_4] : memref<32x64xbf16, #tpu.memory_space<vmem>>, vector<32x64xbf16>
    %c0_5 = arith.constant 0 : index
    %c0_6 = arith.constant 0 : index
    %3 = vector.load %arg6[%c0_5, %c0_6] : memref<64x32xbf16, #tpu.memory_space<vmem>>, vector<64x32xbf16>
    %c0_7 = arith.constant 0 : index
    %c0_8 = arith.constant 0 : index
    %4 = vector.load %arg8[%c0_7, %c0_8] : memref<32x128xbf16, #tpu.memory_space<vmem>>, vector<32x128xbf16>
    %c0_9 = arith.constant 0 : index
    %c0_10 = arith.constant 0 : index
    %5 = vector.load %arg3[%c0_9, %c0_10] : memref<1x32xf32, #tpu.memory_space<vmem>>, vector<1x32xf32>
    %c0_11 = arith.constant 0 : index
    %c0_12 = arith.constant 0 : index
    %6 = vector.load %arg5[%c0_11, %c0_12] : memref<1x64xf32, #tpu.memory_space<vmem>>, vector<1x64xf32>
    %c0_13 = arith.constant 0 : index
    %c0_14 = arith.constant 0 : index
    %7 = vector.load %arg7[%c0_13, %c0_14] : memref<1x32xf32, #tpu.memory_space<vmem>>, vector<1x32xf32>
    %c0_15 = arith.constant 0 : index
    %c0_16 = arith.constant 0 : index
    %8 = vector.load %arg9[%c0_15, %c0_16] : memref<1x128xf32, #tpu.memory_space<vmem>>, vector<1x128xf32>
    %9 = arith.truncf %0 : vector<16x16xf32> to vector<16x16xbf16>
    %cst = arith.constant dense<0.000000e+00> : vector<16x32xf32>
    %10 = tpu.matmul %9, %1, %cst {dimension_numbers = #tpu.dot_dimension_numbers<[1], [0], [0], [1], [0, 0, 1, 1], [], []>} : vector<16x16xbf16>, vector<16x32xbf16>, vector<16x32xf32> -> vector<16x32xf32>
    %11 = vector.broadcast %5 : vector<1x32xf32> to vector<16x32xf32>
    %12 = arith.addf %10, %11 : vector<16x32xf32>
    %cst_17 = arith.constant 0.000000e+00 : f32
    %13 = vector.broadcast %cst_17 : f32 to vector<16x32xf32>
    %14 = arith.maximumf %12, %13 : vector<16x32xf32>
    %15 = vector.extract_strided_slice %14 {offsets = [0, 0], sizes = [8, 32], strides = [1, 1]} : vector<16x32xf32> to vector<8x32xf32>
    %16 = vector.extract_strided_slice %14 {offsets = [8, 0], sizes = [8, 32], strides = [1, 1]} : vector<16x32xf32> to vector<8x32xf32>
    %c0_i32 = arith.constant 0 : i32
    %c10_i32 = arith.constant 10 : i32
    %17 = arith.addi %c0_i32, %c10_i32 : i32
    %c1_i32 = arith.constant 1 : i32
    %18:2 = scf.for %arg11 = %c0_i32 to %17 step %c1_i32 iter_args(%arg12 = %15, %arg13 = %16) -> (vector<8x32xf32>, vector<8x32xf32>)  : i32 {
      %29 = arith.truncf %arg12 : vector<8x32xf32> to vector<8x32xbf16>
      %cst_22 = arith.constant dense<0.000000e+00> : vector<8x64xf32>
      %30 = tpu.matmul %29, %2, %cst_22 {dimension_numbers = #tpu.dot_dimension_numbers<[1], [0], [0], [1], [0, 0, 1, 1], [], []>} : vector<8x32xbf16>, vector<32x64xbf16>, vector<8x64xf32> -> vector<8x64xf32>
      %31 = arith.truncf %arg13 : vector<8x32xf32> to vector<8x32xbf16>
      %cst_23 = arith.constant dense<0.000000e+00> : vector<8x64xf32>
      %32 = tpu.matmul %31, %2, %cst_23 {dimension_numbers = #tpu.dot_dimension_numbers<[1], [0], [0], [1], [0, 0, 1, 1], [], []>} : vector<8x32xbf16>, vector<32x64xbf16>, vector<8x64xf32> -> vector<8x64xf32>
      %33 = vector.broadcast %6 : vector<1x64xf32> to vector<8x64xf32>
      %34 = arith.addf %30, %33 : vector<8x64xf32>
      %cst_24 = arith.constant 0.000000e+00 : f32
      %35 = vector.broadcast %cst_24 : f32 to vector<8x64xf32>
      %36 = arith.maximumf %34, %35 : vector<8x64xf32>
      %37 = vector.broadcast %6 : vector<1x64xf32> to vector<8x64xf32>
      %38 = arith.addf %32, %37 : vector<8x64xf32>
      %cst_25 = arith.constant 0.000000e+00 : f32
      %39 = vector.broadcast %cst_25 : f32 to vector<8x64xf32>
      %40 = arith.maximumf %38, %39 : vector<8x64xf32>
      %41 = arith.truncf %36 : vector<8x64xf32> to vector<8x64xbf16>
      %cst_26 = arith.constant dense<0.000000e+00> : vector<8x32xf32>
      %42 = tpu.matmul %41, %3, %cst_26 {dimension_numbers = #tpu.dot_dimension_numbers<[1], [0], [0], [1], [0, 0, 1, 1], [], []>} : vector<8x64xbf16>, vector<64x32xbf16>, vector<8x32xf32> -> vector<8x32xf32>
      %43 = vector.broadcast %7 : vector<1x32xf32> to vector<8x32xf32>
      %44 = arith.addf %42, %43 : vector<8x32xf32>
      %45 = arith.truncf %40 : vector<8x64xf32> to vector<8x64xbf16>
      %cst_27 = arith.constant dense<0.000000e+00> : vector<8x32xf32>
      %46 = tpu.matmul %45, %3, %cst_27 {dimension_numbers = #tpu.dot_dimension_numbers<[1], [0], [0], [1], [0, 0, 1, 1], [], []>} : vector<8x64xbf16>, vector<64x32xbf16>, vector<8x32xf32> -> vector<8x32xf32>
      %47 = vector.broadcast %7 : vector<1x32xf32> to vector<8x32xf32>
      %48 = arith.addf %46, %47 : vector<8x32xf32>
      %cst_28 = arith.constant 0.0166666675 : f32
      %49 = vector.broadcast %cst_28 : f32 to vector<8x32xf32>
      %50 = arith.mulf %49, %44 : vector<8x32xf32>
      %51 = arith.addf %arg12, %50 : vector<8x32xf32>
      %cst_29 = arith.constant 0.0166666675 : f32
      %52 = vector.broadcast %cst_29 : f32 to vector<8x32xf32>
      %53 = arith.mulf %52, %48 : vector<8x32xf32>
      %54 = arith.addf %arg13, %53 : vector<8x32xf32>
      %cst_30 = arith.constant 5.000000e-02 : f32
      %55 = vector.broadcast %cst_30 : f32 to vector<8x32xf32>
      %56 = arith.mulf %55, %44 : vector<8x32xf32>
      %57 = arith.addf %arg12, %56 : vector<8x32xf32>
      %cst_31 = arith.constant 5.000000e-02 : f32
      %58 = vector.broadcast %cst_31 : f32 to vector<8x32xf32>
      %59 = arith.mulf %58, %48 : vector<8x32xf32>
      %60 = arith.addf %arg13, %59 : vector<8x32xf32>
      %61 = arith.truncf %57 : vector<8x32xf32> to vector<8x32xbf16>
      %cst_32 = arith.constant dense<0.000000e+00> : vector<8x64xf32>
      %62 = tpu.matmul %61, %2, %cst_32 {dimension_numbers = #tpu.dot_dimension_numbers<[1], [0], [0], [1], [0, 0, 1, 1], [], []>} : vector<8x32xbf16>, vector<32x64xbf16>, vector<8x64xf32> -> vector<8x64xf32>
      %63 = arith.truncf %60 : vector<8x32xf32> to vector<8x32xbf16>
      %cst_33 = arith.constant dense<0.000000e+00> : vector<8x64xf32>
      %64 = tpu.matmul %63, %2, %cst_33 {dimension_numbers = #tpu.dot_dimension_numbers<[1], [0], [0], [1], [0, 0, 1, 1], [], []>} : vector<8x32xbf16>, vector<32x64xbf16>, vector<8x64xf32> -> vector<8x64xf32>
      %65 = vector.broadcast %6 : vector<1x64xf32> to vector<8x64xf32>
      %66 = arith.addf %62, %65 : vector<8x64xf32>
      %cst_34 = arith.constant 0.000000e+00 : f32
      %67 = vector.broadcast %cst_34 : f32 to vector<8x64xf32>
      %68 = arith.maximumf %66, %67 : vector<8x64xf32>
      %69 = vector.broadcast %6 : vector<1x64xf32> to vector<8x64xf32>
      %70 = arith.addf %64, %69 : vector<8x64xf32>
      %cst_35 = arith.constant 0.000000e+00 : f32
      %71 = vector.broadcast %cst_35 : f32 to vector<8x64xf32>
      %72 = arith.maximumf %70, %71 : vector<8x64xf32>
      %73 = arith.truncf %68 : vector<8x64xf32> to vector<8x64xbf16>
      %cst_36 = arith.constant dense<0.000000e+00> : vector<8x32xf32>
      %74 = tpu.matmul %73, %3, %cst_36 {dimension_numbers = #tpu.dot_dimension_numbers<[1], [0], [0], [1], [0, 0, 1, 1], [], []>} : vector<8x64xbf16>, vector<64x32xbf16>, vector<8x32xf32> -> vector<8x32xf32>
      %75 = vector.broadcast %7 : vector<1x32xf32> to vector<8x32xf32>
      %76 = arith.addf %74, %75 : vector<8x32xf32>
      %77 = arith.truncf %72 : vector<8x64xf32> to vector<8x64xbf16>
      %cst_37 = arith.constant dense<0.000000e+00> : vector<8x32xf32>
      %78 = tpu.matmul %77, %3, %cst_37 {dimension_numbers = #tpu.dot_dimension_numbers<[1], [0], [0], [1], [0, 0, 1, 1], [], []>} : vector<8x64xbf16>, vector<64x32xbf16>, vector<8x32xf32> -> vector<8x32xf32>
      %79 = vector.broadcast %7 : vector<1x32xf32> to vector<8x32xf32>
      %80 = arith.addf %78, %79 : vector<8x32xf32>
      %cst_38 = arith.constant 0.0333333351 : f32
      %81 = vector.broadcast %cst_38 : f32 to vector<8x32xf32>
      %82 = arith.mulf %81, %76 : vector<8x32xf32>
      %83 = arith.addf %51, %82 : vector<8x32xf32>
      %cst_39 = arith.constant 0.0333333351 : f32
      %84 = vector.broadcast %cst_39 : f32 to vector<8x32xf32>
      %85 = arith.mulf %84, %80 : vector<8x32xf32>
      %86 = arith.addf %54, %85 : vector<8x32xf32>
      %cst_40 = arith.constant 5.000000e-02 : f32
      %87 = vector.broadcast %cst_40 : f32 to vector<8x32xf32>
      %88 = arith.mulf %87, %76 : vector<8x32xf32>
      %89 = arith.addf %arg12, %88 : vector<8x32xf32>
      %cst_41 = arith.constant 5.000000e-02 : f32
      %90 = vector.broadcast %cst_41 : f32 to vector<8x32xf32>
      %91 = arith.mulf %90, %80 : vector<8x32xf32>
      %92 = arith.addf %arg13, %91 : vector<8x32xf32>
      %93 = arith.truncf %89 : vector<8x32xf32> to vector<8x32xbf16>
      %cst_42 = arith.constant dense<0.000000e+00> : vector<8x64xf32>
      %94 = tpu.matmul %93, %2, %cst_42 {dimension_numbers = #tpu.dot_dimension_numbers<[1], [0], [0], [1], [0, 0, 1, 1], [], []>} : vector<8x32xbf16>, vector<32x64xbf16>, vector<8x64xf32> -> vector<8x64xf32>
      %95 = arith.truncf %92 : vector<8x32xf32> to vector<8x32xbf16>
      %cst_43 = arith.constant dense<0.000000e+00> : vector<8x64xf32>
      %96 = tpu.matmul %95, %2, %cst_43 {dimension_numbers = #tpu.dot_dimension_numbers<[1], [0], [0], [1], [0, 0, 1, 1], [], []>} : vector<8x32xbf16>, vector<32x64xbf16>, vector<8x64xf32> -> vector<8x64xf32>
      %97 = vector.broadcast %6 : vector<1x64xf32> to vector<8x64xf32>
      %98 = arith.addf %94, %97 : vector<8x64xf32>
      %cst_44 = arith.constant 0.000000e+00 : f32
      %99 = vector.broadcast %cst_44 : f32 to vector<8x64xf32>
      %100 = arith.maximumf %98, %99 : vector<8x64xf32>
      %101 = vector.broadcast %6 : vector<1x64xf32> to vector<8x64xf32>
      %102 = arith.addf %96, %101 : vector<8x64xf32>
      %cst_45 = arith.constant 0.000000e+00 : f32
      %103 = vector.broadcast %cst_45 : f32 to vector<8x64xf32>
      %104 = arith.maximumf %102, %103 : vector<8x64xf32>
      %105 = arith.truncf %100 : vector<8x64xf32> to vector<8x64xbf16>
      %cst_46 = arith.constant dense<0.000000e+00> : vector<8x32xf32>
      %106 = tpu.matmul %105, %3, %cst_46 {dimension_numbers = #tpu.dot_dimension_numbers<[1], [0], [0], [1], [0, 0, 1, 1], [], []>} : vector<8x64xbf16>, vector<64x32xbf16>, vector<8x32xf32> -> vector<8x32xf32>
      %107 = vector.broadcast %7 : vector<1x32xf32> to vector<8x32xf32>
      %108 = arith.addf %106, %107 : vector<8x32xf32>
      %109 = arith.truncf %104 : vector<8x64xf32> to vector<8x64xbf16>
      %cst_47 = arith.constant dense<0.000000e+00> : vector<8x32xf32>
      %110 = tpu.matmul %109, %3, %cst_47 {dimension_numbers = #tpu.dot_dimension_numbers<[1], [0], [0], [1], [0, 0, 1, 1], [], []>} : vector<8x64xbf16>, vector<64x32xbf16>, vector<8x32xf32> -> vector<8x32xf32>
      %111 = vector.broadcast %7 : vector<1x32xf32> to vector<8x32xf32>
      %112 = arith.addf %110, %111 : vector<8x32xf32>
      %cst_48 = arith.constant 0.0333333351 : f32
      %113 = vector.broadcast %cst_48 : f32 to vector<8x32xf32>
      %114 = arith.mulf %113, %108 : vector<8x32xf32>
      %115 = arith.addf %83, %114 : vector<8x32xf32>
      %cst_49 = arith.constant 0.0333333351 : f32
      %116 = vector.broadcast %cst_49 : f32 to vector<8x32xf32>
      %117 = arith.mulf %116, %112 : vector<8x32xf32>
      %118 = arith.addf %86, %117 : vector<8x32xf32>
      %cst_50 = arith.constant 1.000000e-01 : f32
      %119 = vector.broadcast %cst_50 : f32 to vector<8x32xf32>
      %120 = arith.mulf %119, %108 : vector<8x32xf32>
      %121 = arith.addf %arg12, %120 : vector<8x32xf32>
      %cst_51 = arith.constant 1.000000e-01 : f32
      %122 = vector.broadcast %cst_51 : f32 to vector<8x32xf32>
      %123 = arith.mulf %122, %112 : vector<8x32xf32>
      %124 = arith.addf %arg13, %123 : vector<8x32xf32>
      %125 = arith.truncf %121 : vector<8x32xf32> to vector<8x32xbf16>
      %cst_52 = arith.constant dense<0.000000e+00> : vector<8x64xf32>
      %126 = tpu.matmul %125, %2, %cst_52 {dimension_numbers = #tpu.dot_dimension_numbers<[1], [0], [0], [1], [0, 0, 1, 1], [], []>} : vector<8x32xbf16>, vector<32x64xbf16>, vector<8x64xf32> -> vector<8x64xf32>
      %127 = arith.truncf %124 : vector<8x32xf32> to vector<8x32xbf16>
      %cst_53 = arith.constant dense<0.000000e+00> : vector<8x64xf32>
      %128 = tpu.matmul %127, %2, %cst_53 {dimension_numbers = #tpu.dot_dimension_numbers<[1], [0], [0], [1], [0, 0, 1, 1], [], []>} : vector<8x32xbf16>, vector<32x64xbf16>, vector<8x64xf32> -> vector<8x64xf32>
      %129 = vector.broadcast %6 : vector<1x64xf32> to vector<8x64xf32>
      %130 = arith.addf %126, %129 : vector<8x64xf32>
      %cst_54 = arith.constant 0.000000e+00 : f32
      %131 = vector.broadcast %cst_54 : f32 to vector<8x64xf32>
      %132 = arith.maximumf %130, %131 : vector<8x64xf32>
      %133 = vector.broadcast %6 : vector<1x64xf32> to vector<8x64xf32>
      %134 = arith.addf %128, %133 : vector<8x64xf32>
      %cst_55 = arith.constant 0.000000e+00 : f32
      %135 = vector.broadcast %cst_55 : f32 to vector<8x64xf32>
      %136 = arith.maximumf %134, %135 : vector<8x64xf32>
      %137 = arith.truncf %132 : vector<8x64xf32> to vector<8x64xbf16>
      %cst_56 = arith.constant dense<0.000000e+00> : vector<8x32xf32>
      %138 = tpu.matmul %137, %3, %cst_56 {dimension_numbers = #tpu.dot_dimension_numbers<[1], [0], [0], [1], [0, 0, 1, 1], [], []>} : vector<8x64xbf16>, vector<64x32xbf16>, vector<8x32xf32> -> vector<8x32xf32>
      %139 = vector.broadcast %7 : vector<1x32xf32> to vector<8x32xf32>
      %140 = arith.addf %138, %139 : vector<8x32xf32>
      %141 = arith.truncf %136 : vector<8x64xf32> to vector<8x64xbf16>
      %cst_57 = arith.constant dense<0.000000e+00> : vector<8x32xf32>
      %142 = tpu.matmul %141, %3, %cst_57 {dimension_numbers = #tpu.dot_dimension_numbers<[1], [0], [0], [1], [0, 0, 1, 1], [], []>} : vector<8x64xbf16>, vector<64x32xbf16>, vector<8x32xf32> -> vector<8x32xf32>
      %143 = vector.broadcast %7 : vector<1x32xf32> to vector<8x32xf32>
      %144 = arith.addf %142, %143 : vector<8x32xf32>
      %cst_58 = arith.constant 0.0166666675 : f32
      %145 = vector.broadcast %cst_58 : f32 to vector<8x32xf32>
      %146 = arith.mulf %145, %140 : vector<8x32xf32>
      %147 = arith.addf %115, %146 : vector<8x32xf32>
      %cst_59 = arith.constant 0.0166666675 : f32
      %148 = vector.broadcast %cst_59 : f32 to vector<8x32xf32>
      %149 = arith.mulf %148, %144 : vector<8x32xf32>
      %150 = arith.addf %118, %149 : vector<8x32xf32>
      scf.yield %147, %150 : vector<8x32xf32>, vector<8x32xf32>
    }
    %19 = arith.truncf %18#0 : vector<8x32xf32> to vector<8x32xbf16>
    %cst_18 = arith.constant dense<0.000000e+00> : vector<8x128xf32>
    %20 = tpu.matmul %19, %4, %cst_18 {dimension_numbers = #tpu.dot_dimension_numbers<[1], [0], [0], [1], [0, 0, 1, 1], [], []>} : vector<8x32xbf16>, vector<32x128xbf16>, vector<8x128xf32> -> vector<8x128xf32>
    %21 = vector.broadcast %8 : vector<1x128xf32> to vector<8x128xf32>
    %22 = arith.addf %20, %21 : vector<8x128xf32>
    %23 = arith.truncf %18#1 : vector<8x32xf32> to vector<8x32xbf16>
    %cst_19 = arith.constant dense<0.000000e+00> : vector<8x128xf32>
    %24 = tpu.matmul %23, %4, %cst_19 {dimension_numbers = #tpu.dot_dimension_numbers<[1], [0], [0], [1], [0, 0, 1, 1], [], []>} : vector<8x32xbf16>, vector<32x128xbf16>, vector<8x128xf32> -> vector<8x128xf32>
    %25 = vector.broadcast %8 : vector<1x128xf32> to vector<8x128xf32>
    %26 = arith.addf %24, %25 : vector<8x128xf32>
    %27 = tpu.concatenate %22, %26 in 0 : vector<8x128xf32>, vector<8x128xf32> -> vector<16x128xf32>
    %c0_20 = arith.constant 0 : index
    %c0_21 = arith.constant 0 : index
    %28 = vector.load %arg10[%c0_20, %c0_21] : memref<16x128xf32, #tpu.memory_space<vmem>>, vector<16x128xf32>
    tpu.vector_store %arg10[%c0_20, %c0_21], %27 {strides = array<i32>} : memref<16x128xf32, #tpu.memory_space<vmem>>, vector<16x128xf32>,
    return
  }
  func.func @transform_0(%arg0: i32) -> (i32, i32) {
    %c0_i32 = arith.constant 0 : i32
    %c0_i32_0 = arith.constant 0 : i32
    return %arg0, %c0_i32 : i32, i32
  }
  func.func @transform_1(%arg0: i32) -> (i32, i32) {
    %c0_i32 = arith.constant 0 : i32
    %c0_i32_0 = arith.constant 0 : i32
    %c0_i32_1 = arith.constant 0 : i32
    return %c0_i32, %c0_i32_0 : i32, i32
  }
  func.func @transform_2(%arg0: i32) -> (i32, i32) {
    %c0_i32 = arith.constant 0 : i32
    %c0_i32_0 = arith.constant 0 : i32
    %c0_i32_1 = arith.constant 0 : i32
    return %c0_i32, %c0_i32_0 : i32, i32
  }
  func.func @transform_3(%arg0: i32) -> (i32, i32) {
    %c0_i32 = arith.constant 0 : i32
    %c0_i32_0 = arith.constant 0 : i32
    %c0_i32_1 = arith.constant 0 : i32
    return %c0_i32, %c0_i32_0 : i32, i32
  }
  func.func @transform_4(%arg0: i32) -> (i32, i32) {
    %c0_i32 = arith.constant 0 : i32
    %c0_i32_0 = arith.constant 0 : i32
    %c0_i32_1 = arith.constant 0 : i32
    return %c0_i32, %c0_i32_0 : i32, i32
  }
  func.func @transform_5(%arg0: i32) -> (i32, i32) {
    %c0_i32 = arith.constant 0 : i32
    %c0_i32_0 = arith.constant 0 : i32
    %c0_i32_1 = arith.constant 0 : i32
    return %c0_i32, %c0_i32_0 : i32, i32
  }
  func.func @transform_6(%arg0: i32) -> (i32, i32) {
    %c0_i32 = arith.constant 0 : i32
    %c0_i32_0 = arith.constant 0 : i32
    %c0_i32_1 = arith.constant 0 : i32
    return %c0_i32, %c0_i32_0 : i32, i32
  }
  func.func @transform_7(%arg0: i32) -> (i32, i32) {
    %c0_i32 = arith.constant 0 : i32
    %c0_i32_0 = arith.constant 0 : i32
    %c0_i32_1 = arith.constant 0 : i32
    return %c0_i32, %c0_i32_0 : i32, i32
  }
  func.func @transform_8(%arg0: i32) -> (i32, i32) {
    %c0_i32 = arith.constant 0 : i32
    %c0_i32_0 = arith.constant 0 : i32
    %c0_i32_1 = arith.constant 0 : i32
    return %c0_i32, %c0_i32_0 : i32, i32
  }
  func.func @transform_9(%arg0: i32) -> (i32, i32) {
    %c0_i32 = arith.constant 0 : i32
    %c0_i32_0 = arith.constant 0 : i32
    return %arg0, %c0_i32 : i32, i32
  }
}

</mosaic_0001>

<bundles_post_ra>
// kernel: tpu_custom_call.1
= control target key start
LH: loop header
LB: loop body
LE: loop exit
PB: predicated region body
PF: predicated region fallthrough
CT: control target
= control target key end

     0   :  { %14 = vsyncpa [#allocation3], 0  ;;  %s1034_s0 = inlined_call_operand.vmem [shape: f32[16,16], index: 0, kind: input, shape index: {}]   ;;  %s1035_s1 = inlined_call_operand.hbm [shape: bf16[16,32], index: 1, kind: input, shape index: {}]   ;;  %s1036_s2 = inlined_call_operand.vmem [shape: f32[1,32], index: 2, kind: input, shape index: {}]   ;;  %s1037_s3 = inlined_call_operand.vmem [shape: bf16[32,64], index: 3, kind: input, shape index: {}]   ;;  %s1038_s4 = inlined_call_operand.vmem [shape: f32[1,64], index: 4, kind: input, shape index: {}]   ;;  %s1039_s5 = inlined_call_operand.vmem [shape: bf16[64,32], index: 5, kind: input, shape index: {}]   ;;  %s1040_s6 = inlined_call_operand.vmem [shape: f32[1,32], index: 6, kind: input, shape index: {}]   ;;  %s1041_s7 = inlined_call_operand.vmem [shape: bf16[32,128], index: 7, kind: input, shape index: {}]   ;;  %s1042_s8 = inlined_call_operand.vmem [shape: f32[1,128], index: 8, kind: input, shape index: {}]   ;;  %s1043_s9 = inlined_call_operand.hbm [shape: f32[16,128], index: 9, kind: output, shape index: {}]  }
   0x1   :  { %15 = vsyncpa [#allocation4], 0  ;;  %s22_s11 = sshll.u32 %s1035_s1, 4  ;;  %s717_s12 = smov [#allocation2]   ;;  %s23_s11 = int_to_ptr.hbm [resolvable:$true] %s22_s11 }
   0x2   :  { %s24_s13 = sshll.u32 %s717_s12, 4  ;;  %s718_s14 = smov 64   ;;  %s25_s13 = int_to_ptr.vmem [resolvable:$true] %s24_s13 }
   0x3   :  { %s719_s15 = smov 4  }
   0x4   :  { %30 = dma.hbm_to_vmem [thread:$0]  %s23_s11, 128, %s25_s13, [#allocation3], %s718_s14, %s718_s14, %s719_s15  }
   0x5   :  { %701 = dma.done.wait [#allocation3], 128  }
   0x6   :  { %702 = vsyncadd [#allocation3], 4294967168  ;;  %v779_v0 = vld [vmem:[%s1037_s3] sm:$0xf]  ;;  %v784_v1 = vld [vmem:[%s1037_s3] sm:$0xf0] }
   0x7   :  { %v789_v2 = vld [vmem:[%s1037_s3 + $0x8] sm:$0xf]  ;;  %v794_v3 = vld [vmem:[%s1037_s3 + $0x8] sm:$0xf0]  ;;  %v799_v4 = vld [vmem:[%s1039_s5] sm:$0xf] }
   0x8   :  { %v804_v5 = vld [vmem:[%s1039_s5] sm:$0xf0]  ;;  %v809_v6 = vld [vmem:[%s1039_s5 + $0x8] sm:$0xf]  ;;  %v814_v7 = vld [vmem:[%s1039_s5 + $0x8] sm:$0xf0] }
   0x9   :  { %v819_v8 = vld [vmem:[%s1039_s5 + $0x10] sm:$0xf]  ;;  %v824_v9 = vld [vmem:[%s1039_s5 + $0x10] sm:$0xf0]  ;;  %v829_v10 = vld [vmem:[%s1039_s5 + $0x18] sm:$0xf] }
   0xa   :  { %v834_v11 = vld [vmem:[%s1039_s5 + $0x18] sm:$0xf0]  ;;  %v839_v12 = vld [vmem:[%s1041_s7] sm:$0xf]  ;;  %v844_v13 = vld [vmem:[%s1041_s7] sm:$0xf0] }
   0xb   :  { %v849_v14 = vld [vmem:[%s1041_s7 + $0x8] sm:$0xf]  ;;  %v854_v15 = vld [vmem:[%s1041_s7 + $0x8] sm:$0xf0]  ;;  %v859_v16 = vld [vmem:[%s1038_s4] sm:$0x1] }
   0xc   :  { %v864_v17 = vld [vmem:[%s1040_s6] sm:$0x1]  ;;  %v51_v21 = vld [vmem:[%s1034_s0 + $0x8] sm:$0xff]  ;;  %vm84_vm0 = vcmask 130048  }
   0xd   :  { %v869_v18 = vld [vmem:[%s1042_s8] sm:$0x1]  ;;  %s884_s8 = smov 0  }
   0xe   :  { %v601_v19 = vld [vmem:[#allocation2] sm:$0xff] }
   0xf   :  { %v50_v20 = vld [vmem:[%s1034_s0] sm:$0xff]  ;;  %95 = vmatpush.bf16.msra.mxu0 %v601_v19 }
  0x10   :  { %v74_v22 = vpack.c.bf16 %v51_v21, %v50_v20  ;;  %v640_v23 = vld [vmem:[%s1036_s2] ss:$0 sm:$0xff] }
  0x12   :  { %550 = vmatmul.msk.bf16.vlgmr.msra.gmra.mxu0 %vm84_vm0, %v74_v22 }
  0x8f   :  { %v97_v24 = vpop.f32.mrf.mxu0 }
  0x90   :  { %v98_v25 = vadd.f32 %v640_v23, %v97_v24 }
  0x92   :  { %v102_v26 = vmax.f32 %v98_v25, 0.0  }
  0x97   :  { %v99_v27 = vpop.f32.mrf.mxu0 }
  0x98   :  { %v100_v28 = vadd.f32 %v640_v23, %v99_v27 }
  0x9a   :  { %v103_v29 = vmax.f32 %v100_v28, 0.0  }
  0x9b LB: > { %v897_v30 = vor.u32 %v794_v3, %v789_v2  ;;  %v901_v31 = vor.u32 %v834_v11, %v829_v10  ;;  %v907_v32 = vor.u32 %v784_v1, %v779_v0  ;;  %v913_v33 = vor.u32 %v824_v9, %v819_v8  ;;  %s109_s8 = sadd.s32 1, %s715_s8   ;;  %s715_s8 = sphi %s884_s8, %s109_s8   ;;  %v711_v26 = vphi %v102_v26, %v1045_v26   ;;  %v707_v29 = vphi %v103_v29, %v1044_v29  }
  0x9c   : > { %v112_v34 = vpack.c.bf16 %v711_v26, %v711_v26  ;;  %v113_v35 = vpack.c.bf16 %v707_v29, %v707_v29  ;;  %vm129_vm1 = vcmask 261120   ;;  %v935_v36 = vor.u32 %v814_v7, %v809_v6  ;;  %p106_p0 = scmp.ge.s32.totalorder %s109_s8, 10  }
  0x9d   : > { %139 = vmatpush.bf16.msra.mxu0 %v897_v30  ;;  %156 = vmatpush.bf16.msra.mxu1 %v897_v30  ;;  %v941_v37 = vor.u32 %v804_v5, %v799_v4  ;;  %v954_v38 = vperm.slane %v859_v16, 0  ;;  %vm192_vm2 = vcmask 523264   ;;  %v969_v49 = vperm.slane %v864_v17, 0  ;;  %s720_s0 = smov (%p106_p0), [#allocation5]   ;;  %s522_s12 = sshll.u32 (%p106_p0), %s1043_s9, 4  ;;  %s523_s12 = int_to_ptr.hbm [resolvable:$true] %s522_s12 }
  0x9e   : > { %200 = vmatpush.bf16.msra.mxu2 %v901_v31  ;;  %217 = vmatpush.bf16.msra.mxu3 %v901_v31  ;;  %s520_s2 = sshll.u32 (%p106_p0), %s720_s0, 4  ;;  %s721_s13 = smov (%p106_p0), 128   ;;  %s521_s2 = int_to_ptr.vmem [resolvable:$true] %s520_s2 }
  0x9f   :  { %s722_s14 = smov (%p106_p0), 8  }
  0xa1   : > { %140 = vmatpush.bf16.msra.mxu0 %v907_v32  ;;  %157 = vmatpush.bf16.msra.mxu1 %v907_v32 }
  0xa2   : > { %201 = vmatpush.bf16.msra.mxu2 %v913_v33  ;;  %218 = vmatpush.bf16.msra.mxu3 %v913_v33 }
  0xa4   : > { %559 = vmatmul.msk.bf16.vlgmr.msra.gmra.mxu0 %vm129_vm1, %v112_v34  ;;  %560 = vmatmul.msk.bf16.vlgmr.msra.gmra.mxu1 %vm129_vm1, %v113_v35 }
  0xa5   : > { %245 = vmatpush.bf16.msrb.mxu0 %v897_v30  ;;  %262 = vmatpush.bf16.msrb.mxu1 %v897_v30 }
  0xa6   : > { %202 = vmatpush.bf16.msra.mxu2 %v935_v36  ;;  %219 = vmatpush.bf16.msra.mxu3 %v935_v36 }
  0xa9   : > { %246 = vmatpush.bf16.msrb.mxu0 %v907_v32  ;;  %263 = vmatpush.bf16.msrb.mxu1 %v907_v32 }
  0xaa   : > { %203 = vmatpush.bf16.msra.mxu2 %v941_v37  ;;  %220 = vmatpush.bf16.msra.mxu3 %v941_v37 }
  0xad   : > { %323 = vmatpush.bf16.msra.mxu0 %v897_v30  ;;  %340 = vmatpush.bf16.msra.mxu1 %v897_v30 }
  0xae   : > { %278 = vmatpush.bf16.msrb.mxu2 %v901_v31  ;;  %295 = vmatpush.bf16.msrb.mxu3 %v901_v31 }
  0xb1   : > { %324 = vmatpush.bf16.msra.mxu0 %v907_v32  ;;  %341 = vmatpush.bf16.msra.mxu1 %v907_v32 }
  0xb2   : > { %279 = vmatpush.bf16.msrb.mxu2 %v913_v33  ;;  %296 = vmatpush.bf16.msrb.mxu3 %v913_v33 }
  0xb6   : > { %280 = vmatpush.bf16.msrb.mxu2 %v935_v36  ;;  %297 = vmatpush.bf16.msrb.mxu3 %v935_v36 }
  0xba   : > { %281 = vmatpush.bf16.msrb.mxu2 %v941_v37  ;;  %298 = vmatpush.bf16.msrb.mxu3 %v941_v37 }
 0x121   : > { %v142_v39 = vpop.f32.mrf.mxu0  ;;  %v159_v40 = vpop.f32.mrf.mxu1 }
 0x122   : > { %v143_v41 = vadd.f32 %v142_v39, %v954_v38  ;;  %v160_v42 = vadd.f32 %v159_v40, %v954_v38 }
 0x124   : > { %v146_v43 = vmax.f32 %v143_v41, 0.0  ;;  %v163_v44 = vmax.f32 %v160_v42, 0.0 }
 0x126   : > { %v164_v45 = vpack.c.bf16 %v146_v43, %v146_v43  ;;  %v209_v46 = vpack.c.bf16 %v163_v44, %v163_v44 }
 0x128   : > { %577 = vmatmul.msk.bf16.vlgmr.msra.gmra.mxu2 %vm192_vm2, %v164_v45  ;;  %578 = vmatmul.msk.bf16.vlgmr.msra.gmra.mxu3 %vm192_vm2, %v209_v46 }
 0x129   : > { %v144_v47 = vpop.f32.mrf.mxu0  ;;  %v161_v48 = vpop.f32.mrf.mxu1  ;;  %356 = vmatpush.bf16.msra.mxu2 %v901_v31  ;;  %373 = vmatpush.bf16.msra.mxu3 %v901_v31 }
 0x12d   : > { %357 = vmatpush.bf16.msra.mxu2 %v913_v33  ;;  %374 = vmatpush.bf16.msra.mxu3 %v913_v33 }
 0x131   : > { %358 = vmatpush.bf16.msra.mxu2 %v935_v36  ;;  %375 = vmatpush.bf16.msra.mxu3 %v935_v36 }
 0x135   : > { %359 = vmatpush.bf16.msra.mxu2 %v941_v37  ;;  %376 = vmatpush.bf16.msra.mxu3 %v941_v37 }
 0x1ab   : > { %v205_v50 = vpop.f32.mrf.mxu2  ;;  %v222_v51 = vpop.f32.mrf.mxu3 }
 0x1ac   : > { %v206_v52 = vadd.f32 %v205_v50, %v969_v49  ;;  %v223_v53 = vadd.f32 %v222_v51, %v969_v49 }
 0x1ae   : > { %v230_v54 = vmul.f32 0.05, %v206_v52  ;;  %v232_v55 = vmul.f32 0.05, %v223_v53  ;;  %v226_v28 = vmul.f32 0.016666668, %v206_v52 }
 0x1b0   : > { %v231_v56 = vadd.f32 %v711_v26, %v230_v54  ;;  %v233_v57 = vadd.f32 %v707_v29, %v232_v55  ;;  %v227_v39 = vadd.f32 %v711_v26, %v226_v28 }
 0x1b2   : > { %v234_v58 = vpack.c.bf16 %v231_v56, %v231_v56  ;;  %v235_v59 = vpack.c.bf16 %v233_v57, %v233_v57 }
 0x1b3   : > { %v207_v60 = vpop.f32.mrf.mxu2  ;;  %v224_v61 = vpop.f32.mrf.mxu3 }
 0x1b4   : > { %579 = vmatmul.msk.bf16.vlgmr.msrb.gmra.mxu0 %vm129_vm1, %v234_v58  ;;  %580 = vmatmul.msk.bf16.vlgmr.msrb.gmra.mxu1 %vm129_vm1, %v235_v59 }
 0x1b5   : > { %401 = vmatpush.bf16.msrb.mxu0 %v897_v30  ;;  %418 = vmatpush.bf16.msrb.mxu1 %v897_v30  ;;  %v228_v30 = vmul.f32 0.016666668, %v223_v53 }
 0x1b7   : > { %v229_v41 = vadd.f32 %v707_v29, %v228_v30 }
 0x1b9   : > { %402 = vmatpush.bf16.msrb.mxu0 %v907_v32  ;;  %419 = vmatpush.bf16.msrb.mxu1 %v907_v32 }
 0x231   : > { %v248_v62 = vpop.f32.mrf.mxu0  ;;  %v265_v19 = vpop.f32.mrf.mxu1 }
 0x232   : > { %v249_v63 = vadd.f32 %v248_v62, %v954_v38  ;;  %v266_v20 = vadd.f32 %v265_v19, %v954_v38 }
 0x234   : > { %v252_v21 = vmax.f32 %v249_v63, 0.0  ;;  %v269_v22 = vmax.f32 %v266_v20, 0.0 }
 0x236   : > { %v270_v23 = vpack.c.bf16 %v252_v21, %v252_v21  ;;  %v287_v24 = vpack.c.bf16 %v269_v22, %v269_v22 }
 0x238   : > { %581 = vmatmul.msk.bf16.vlgmr.msrb.gmra.mxu2 %vm192_vm2, %v270_v23  ;;  %582 = vmatmul.msk.bf16.vlgmr.msrb.gmra.mxu3 %vm192_vm2, %v287_v24 }
 0x239   : > { %v250_v25 = vpop.f32.mrf.mxu0  ;;  %434 = vmatpush.bf16.msrb.mxu2 %v901_v31  ;;  %v267_v27 = vpop.f32.mrf.mxu1  ;;  %451 = vmatpush.bf16.msrb.mxu3 %v901_v31 }
 0x23d   : > { %435 = vmatpush.bf16.msrb.mxu2 %v913_v33  ;;  %452 = vmatpush.bf16.msrb.mxu3 %v913_v33 }
 0x241   : > { %436 = vmatpush.bf16.msrb.mxu2 %v935_v36  ;;  %453 = vmatpush.bf16.msrb.mxu3 %v935_v36 }
 0x245   : > { %437 = vmatpush.bf16.msrb.mxu2 %v941_v37  ;;  %454 = vmatpush.bf16.msrb.mxu3 %v941_v37 }
 0x2bb   : > { %v283_v32 = vpop.f32.mrf.mxu2  ;;  %v300_v35 = vpop.f32.mrf.mxu3 }
 0x2bc   : > { %v284_v34 = vadd.f32 %v283_v32, %v969_v49  ;;  %v301_v31 = vadd.f32 %v300_v35, %v969_v49 }
 0x2be   : > { %v304_v40 = vmul.f32 0.033333335, %v284_v34  ;;  %v308_v33 = vmul.f32 0.05, %v284_v34  ;;  %v306_v42 = vmul.f32 0.033333335, %v301_v31 }
 0x2bf   : > { %v310_v36 = vmul.f32 0.05, %v301_v31 }
 0x2c0   : > { %v305_v43 = vadd.f32 %v304_v40, %v227_v39  ;;  %v309_v44 = vadd.f32 %v711_v26, %v308_v33  ;;  %v307_v37 = vadd.f32 %v306_v42, %v229_v41 }
 0x2c1   : > { %v311_v45 = vadd.f32 %v707_v29, %v310_v36 }
 0x2c2   : > { %v312_v46 = vpack.c.bf16 %v309_v44, %v309_v44 }
 0x2c3   : > { %v313_v47 = vpack.c.bf16 %v311_v45, %v311_v45  ;;  %v285_v48 = vpop.f32.mrf.mxu2  ;;  %v302_v50 = vpop.f32.mrf.mxu3 }
 0x2c4   : > { %583 = vmatmul.msk.bf16.vlgmr.msra.gmra.mxu0 %vm129_vm1, %v312_v46 }
 0x2c5   : > { %584 = vmatmul.msk.bf16.vlgmr.msra.gmra.mxu1 %vm129_vm1, %v313_v47 }
 0x341   : > { %v326_v51 = vpop.f32.mrf.mxu0 }
 0x342   : > { %v327_v52 = vadd.f32 %v326_v51, %v954_v38  ;;  %v343_v53 = vpop.f32.mrf.mxu1 }
 0x343   : > { %v344_v54 = vadd.f32 %v343_v53, %v954_v38  ;;  %v598_v53 = vor.u32 (%p106_p0), %v854_v15, %v849_v14 }
 0x344   : > { %v330_v55 = vmax.f32 %v327_v52, 0.0 }
 0x345   : > { %v347_v56 = vmax.f32 %v344_v54, 0.0  ;;  %490 = vmatpush.bf16.msra.mxu0 (%p106_p0), %v598_v53  ;;  %507 = vmatpush.bf16.msra.mxu1 (%p106_p0), %v598_v53 }
 0x346   : > { %v348_v57 = vpack.c.bf16 %v330_v55, %v330_v55 }
 0x347   : > { %v365_v58 = vpack.c.bf16 %v347_v56, %v347_v56  ;;  %v466_v56 = vperm.slane (%p106_p0), %v869_v18, 0 }
 0x348   : > { %585 = vmatmul.msk.bf16.vlgmr.msra.gmra.mxu2 %vm192_vm2, %v348_v57 }
 0x349   : > { %586 = vmatmul.msk.bf16.vlgmr.msra.gmra.mxu3 %vm192_vm2, %v365_v58  ;;  %v328_v59 = vpop.f32.mrf.mxu0 }
 0x34a   : > { %v345_v60 = vpop.f32.mrf.mxu1 }
 0x3cb   : > { %v361_v61 = vpop.f32.mrf.mxu2 }
 0x3cc   : > { %v362_v62 = vadd.f32 %v361_v61, %v969_v49  ;;  %v378_v63 = vpop.f32.mrf.mxu3 }
 0x3cd   : > { %v379_v19 = vadd.f32 %v378_v63, %v969_v49 }
 0x3ce   : > { %v382_v20 = vmul.f32 0.033333335, %v362_v62  ;;  %v386_v21 = vmul.f32 0.1, %v362_v62 }
 0x3cf   : > { %v384_v22 = vmul.f32 0.033333335, %v379_v19  ;;  %v388_v23 = vmul.f32 0.1, %v379_v19 }
 0x3d0   : > { %v383_v24 = vadd.f32 %v382_v20, %v305_v43  ;;  %v387_v25 = vadd.f32 %v711_v26, %v386_v21 }
 0x3d1   : > { %v385_v27 = vadd.f32 %v384_v22, %v307_v37  ;;  %v389_v28 = vadd.f32 %v707_v29, %v388_v23 }
 0x3d2   : > { %v390_v30 = vpack.c.bf16 %v387_v25, %v387_v25 }
 0x3d3   : > { %v391_v32 = vpack.c.bf16 %v389_v28, %v389_v28  ;;  %v363_v34 = vpop.f32.mrf.mxu2 }
 0x3d4   : > { %v380_v35 = vpop.f32.mrf.mxu3  ;;  %587 = vmatmul.msk.bf16.vlgmr.msrb.gmra.mxu0 %vm129_vm1, %v390_v30 }
 0x3d5   : > { %588 = vmatmul.msk.bf16.vlgmr.msrb.gmra.mxu1 %vm129_vm1, %v391_v32 }
 0x451   : > { %v404_v31 = vpop.f32.mrf.mxu0 }
 0x452   : > { %v405_v39 = vadd.f32 %v404_v31, %v954_v38  ;;  %v421_v40 = vpop.f32.mrf.mxu1 }
 0x453   : > { %v422_v33 = vadd.f32 %v421_v40, %v954_v38 }
 0x454   : > { %v408_v41 = vmax.f32 %v405_v39, 0.0 }
 0x455   : > { %v425_v42 = vmax.f32 %v422_v33, 0.0 }
 0x456   : > { %v426_v26 = vpack.c.bf16 %v408_v41, %v408_v41 }
 0x457   : > { %v443_v36 = vpack.c.bf16 %v425_v42, %v425_v42 }
 0x458   : > { %589 = vmatmul.msk.bf16.vlgmr.msrb.gmra.mxu2 %vm192_vm2, %v426_v26 }
 0x459   : > { %590 = vmatmul.msk.bf16.vlgmr.msrb.gmra.mxu3 %vm192_vm2, %v443_v36  ;;  %v406_v29 = vpop.f32.mrf.mxu0 }
 0x45a   : > { %v423_v43 = vpop.f32.mrf.mxu1 }
 0x4db   : > { %v439_v44 = vpop.f32.mrf.mxu2 }
 0x4dc   : > { %v440_v37 = vadd.f32 %v439_v44, %v969_v49  ;;  %v456_v45 = vpop.f32.mrf.mxu3 }
 0x4dd   : > { %v457_v46 = vadd.f32 %v456_v45, %v969_v49  ;;  %v594_v49 = vor.u32 (%p106_p0), %v844_v13, %v839_v12 }
 0x4de   : > { %v460_v47 = vmul.f32 0.016666668, %v440_v37 }
 0x4df   : > { %v462_v48 = vmul.f32 0.016666668, %v457_v46  ;;  %491 = vmatpush.bf16.msra.mxu0 (%p106_p0), %v594_v49  ;;  %508 = vmatpush.bf16.msra.mxu1 (%p106_p0), %v594_v49 }
 0x4e0   : > { %v461_v50 = vadd.f32 %v460_v47, %v383_v24   ;;  %108 = sbr.rel (!%p106_p0) target bundleno = 155 (0x9b), region = 67 }
 0x4e1   : > { %v463_v38 = vadd.f32 %v462_v48, %v385_v27  }
 0x4e2   : > { %v1045_v26 = vmov %v461_v50  ;;  %v464_v54 = vpack.c.bf16 (%p106_p0), %v461_v50, %v461_v50 }
 0x4e3   : > { %v441_v51 = vpop.f32.mrf.mxu2  ;;  %v1044_v29 = vmov %v463_v38  ;;  %v497_v55 = vpack.c.bf16 (%p106_p0), %v463_v38, %v463_v38 }
 0x4e4   : > { %v458_v52 = vpop.f32.mrf.mxu3  ;;  %599 = vmatmul.msk.bf16.vlgmr.msra.gmra.mxu0 (%p106_p0), %vm129_vm1, %v464_v54 }
 0x4e5   :  { %600 = vmatmul.msk.bf16.vlgmr.msra.gmra.mxu1 %vm129_vm1, %v497_v55 }
 0x561   :  { %v493_v0 = vpop.f32.mrf.mxu0 }
 0x562   :  { %v510_v1 = vpop.f32.mrf.mxu1  ;;  %v494_v2 = vadd.f32 %v493_v0, %v466_v56 }
 0x563   :  { %v511_v3 = vadd.f32 %v510_v1, %v466_v56 }
 0x564   :  { %514 = vst [vmem:[#allocation5] sm:$0xff] %v494_v2 }
 0x565   :  { %515 = vst [vmem:[#allocation5 + $0x8] sm:$0xff] %v511_v3 }
 0x566   :  { %528 = dma.vmem_to_hbm [thread:$0]  %s521_s2, 256, %s523_s12, [#allocation4], %s721_s13, %s721_s13, %s722_s14  }
 0x569   :  { %v495_v4 = vpop.f32.mrf.mxu0 }
 0x56a   :  { %v512_v5 = vpop.f32.mrf.mxu1 }
 0x56b   :  { %703 = dma.done.wait [#allocation4], 256  }
 0x56c   :  { %704 = vsyncadd [#allocation4], 4294967040 }
 0x56d   :  { %533 = vsyncpa [#allocation3], 1 }
 0x56e   :  { %534 = vsyncpa [#allocation4], 1 }

</bundles_post_ra>
